<compile_context>
chip_gen: v7x
topology: tpu7x:2x2x1
jax: 0.10.0
libtpu: 0.0.40
codegen_flags: <defaults>
</compile_context>

<pallas_src>
import functools

import jax
import jax.numpy as jnp
from jax import lax
from jax.experimental import pallas as pl
from jax.experimental.pallas import tpu as pltpu


# ---------------------------------------------------------------------------
# Pallas kernel: streaming JtR = sum_n Jt[:, n] * (weights[n] * R[n]).
# ---------------------------------------------------------------------------
def _jtr_kernel(jt_ref, w_ref, r_ref, jtr_ref, acc_ref, *,
                n_elems, tn, nk_inner, needs_mask):
    k = pl.program_id(2)

    @pl.when(k == 0)
    def _():
        acc_ref[...] = jnp.zeros_like(acc_ref)

    # Per-tile loads, cast to f32 in-register (supports bf16 inputs for free).
    jt = jt_ref[0].astype(jnp.float32)                       # (6, TN)
    wr = (w_ref[0].astype(jnp.float32) *
          r_ref[0].astype(jnp.float32))                      # (1, TN)
    contrib = jt * wr                                        # (6, TN)  VPU only

    if needs_mask:
        s = pl.program_id(1)
        kb = s * nk_inner + k                                # global lane-block index
        lane = lax.broadcasted_iota(jnp.int32, (1, tn), 1)
        valid = (kb * tn + lane) < n_elems                   # (1, TN) tail mask
        contrib = jnp.where(valid, contrib, 0.0)

    # Hot loop stays pure VPU: no cross-lane reduce per step.
    acc_ref[...] += contrib

    @pl.when(k == nk_inner - 1)
    def _():
        # Single XLU cross-lane reduce in the epilogue only.
        jtr_ref[0] = jnp.sum(acc_ref[...], axis=1, keepdims=True)   # (6, 1)


def fused_jtr(Jt, weights, R, *, tn_max=4096):
    """Returns JtR [B, 6, 1] = Jt @ (weights * R).flatten per batch (f32)."""
    B, _, N = Jt.shape
    w_flat = weights.reshape(B, 1, N)
    r_flat = R.reshape(B, 1, N)

    round_up = lambda x, m: (x + m - 1) // m * m
    TN = min(tn_max, round_up(N, 128))          # lane tile, always multiple of 128
    nk_total = pl.cdiv(N, TN)
    # Guarantee >= 2 parallel grid units for dual-TensorCore chips (v7x) at B == 1.
    S = 2 if (B == 1 and nk_total >= 2) else 1
    nk_inner = pl.cdiv(nk_total, S)
    needs_mask = (S * nk_inner * TN) != N
    need_clamp = (S * nk_inner) > nk_total

    def kmap(s, k):
        kb = s * nk_inner + k
        return jnp.minimum(kb, nk_total - 1) if need_clamp else kb

    kernel = functools.partial(
        _jtr_kernel, n_elems=N, tn=TN, nk_inner=nk_inner, needs_mask=needs_mask)

    grid_spec = pltpu.PrefetchScalarGridSpec(
        num_scalar_prefetch=0,
        grid=(B, S, nk_inner),
        in_specs=[
            pl.BlockSpec((1, 6, TN), lambda b, s, k: (b, 0, kmap(s, k))),   # Jt
            pl.BlockSpec((1, 1, TN), lambda b, s, k: (b, 0, kmap(s, k))),   # weights
            pl.BlockSpec((1, 1, TN), lambda b, s, k: (b, 0, kmap(s, k))),   # residual
        ],
        out_specs=pl.BlockSpec((1, 6, 1), lambda b, s, k: (b * S + s, 0, 0)),
        scratch_shapes=[pltpu.VMEM((6, TN), jnp.float32)],
    )

    jtr_partial = pl.pallas_call(
        kernel,
        out_shape=jax.ShapeDtypeStruct((B * S, 6, 1), jnp.float32),
        grid_spec=grid_spec,
        compiler_params=pltpu.CompilerParams(
            dimension_semantics=("parallel", "parallel", "arbitrary"),
            vmem_limit_bytes=32 * 1024 * 1024),
    )(Jt, w_flat, r_flat)

    # Sum the per-split partials (trivial when S == 1).
    return jnp.sum(jtr_partial.reshape(B, S, 6, 1), axis=1)


# ---------------------------------------------------------------------------
# Plain-JAX glue: Levenberg damping, tiny 6x6 solve, Rodrigues, pose compose.
# ---------------------------------------------------------------------------
def lev_mar_H(JtJ):
    """Hessian = JtJ + 1e-6 * trace(diag(JtJ)) * I  (tiny (B,6,6) op)."""
    eye = jnp.eye(6, dtype=JtJ.dtype)[None]
    trace = jnp.sum(eye * JtJ, axis=(1, 2))
    return JtJ + (trace * 1e-6)[:, None, None] * eye


def batch_twist2Mat(twist, eps=1e-12):
    """Rodrigues: so(3) twist [B,3] -> rotation matrix [B,3,3]."""
    B = twist.shape[0]
    theta = jnp.maximum(jnp.linalg.norm(twist, axis=1, keepdims=True), eps)
    w = twist / theta
    zeros = jnp.zeros((B,), twist.dtype)
    wx = jnp.stack([
        zeros, -w[:, 2], w[:, 1],
        w[:, 2], zeros, -w[:, 0],
        -w[:, 1], w[:, 0], zeros,
    ], axis=1).reshape(B, 3, 3)
    eye = jnp.broadcast_to(jnp.eye(3, dtype=twist.dtype), (B, 3, 3))
    s = jnp.sin(theta)[:, :, None]
    c = jnp.cos(theta)[:, :, None]
    return eye + s * wx + (1.0 - c) * jnp.matmul(wx, wx)


def batch_Rt_compose(R0, t0, dR, dt):
    """Compose: R_new = R0 @ dR, t_new = R0 @ dt + t0."""
    return jnp.matmul(R0, dR), jnp.matmul(R0, dt) + t0


def least_square_solve(H, Rhs):
    """xi = H^{-1} @ Rhs  (matches the PyTorch code: inverse then bmm)."""
    return jnp.matmul(jnp.linalg.inv(H), Rhs)


def inverse_update_pose(H, Rhs, pose):
    xi = least_square_solve(H, Rhs)            # [B,6,1]
    d_R = batch_twist2Mat(-xi[:, :3, 0])       # [B,3,3]
    d_t = -jnp.matmul(d_R, xi[:, 3:, :])       # [B,3,1]
    R0, t0 = pose
    return batch_Rt_compose(R0, t0, d_R, d_t)


# ---------------------------------------------------------------------------
# DirectSolverNet forward (Direct-Nodamping, inverse compositional).
# ---------------------------------------------------------------------------
@jax.jit
def direct_solver_forward(JtJ, Jt, weights, R, pose0, invD0, invD1, x0, x1, K):
    # invD0, invD1, x0, x1, K unused in the no-damping branch (kept for parity).
    JtR = fused_jtr(Jt, weights, R)
    Hessian = lev_mar_H(JtJ.astype(jnp.float32))
    return inverse_update_pose(Hessian, JtR, pose0)


# ---------------------------------------------------------------------------
# Pure-JAX reference (mirrors the PyTorch math) for a correctness check.
# ---------------------------------------------------------------------------
def reference_forward(JtJ, Jt, weights, R, pose0):
    B = JtJ.shape[0]
    wR = (weights * R).reshape(B, -1, 1)
    JtR = jnp.matmul(Jt, wR)
    eye = jnp.eye(6, dtype=JtJ.dtype)[None]
    diagJtJ = eye * JtJ
    trace = jnp.sum(diagJtJ, axis=(2, 1))
    hessian = JtJ + (trace * 1e-6)[:, None, None] * eye
    return inverse_update_pose(hessian, JtR, pose0)


if __name__ == "__main__":
    key = jax.random.PRNGKey(0)
    B, C, H, W = 2, 4, 16, 16
    N = C * H * W

    ks = jax.random.split(key, 8)
    # Well-conditioned SPD-ish JtJ.
    A = jax.random.normal(ks[0], (B, 6, 6), jnp.float32)
    JtJ = jnp.matmul(A, jnp.swapaxes(A, 1, 2)) + 6.0 * jnp.eye(6)[None]
    Jt = jax.random.normal(ks[1], (B, 6, N), jnp.float32) * 0.1
    weights = jax.nn.sigmoid(jax.random.normal(ks[2], (B, C, H, W), jnp.float32))
    Res = jax.random.normal(ks[3], (B, C, H, W), jnp.float32) * 0.05

    # Initial pose: small rotation + translation.
    R0 = batch_twist2Mat(0.05 * jax.random.normal(ks[4], (B, 3), jnp.float32))
    t0 = 0.1 * jax.random.normal(ks[5], (B, 3, 1), jnp.float32)
    pose0 = (R0, t0)

    # Unused-by-this-branch tensors (kept for interface parity).
    invD0 = jnp.abs(jax.random.normal(ks[6], (B, 1, H, W), jnp.float32))
    invD1 = jnp.abs(jax.random.normal(ks[7], (B, 1, H, W), jnp.float32))
    x0 = jnp.zeros((B, C, H, W), jnp.float32)
    x1 = jnp.zeros((B, C, H, W), jnp.float32)
    K = jnp.tile(jnp.array([100.0, 100.0, 8.0, 8.0], jnp.float32)[None], (B, 1))

    R_new, t_new = direct_solver_forward(
        JtJ, Jt, weights, Res, pose0, invD0, invD1, x0, x1, K)
    jax.block_until_ready((R_new, t_new))

    R_ref, t_ref = reference_forward(JtJ, Jt, weights, Res, pose0)
    assert jnp.allclose(R_new, R_ref, atol=1e-4, rtol=1e-4), "rotation mismatch"
    assert jnp.allclose(t_new, t_ref, atol=1e-4, rtol=1e-4), "translation mismatch"
    assert R_new.shape == (B, 3, 3) and t_new.shape == (B, 3, 1)

    print("KERNEL_OK")
</pallas_src>

<mosaic_0001>
module attributes {stable_mosaic.version = 11 : i64} {
  func.func @_jtr_kernel(%arg0: i32, %arg1: i32, %arg2: i32, %arg3: memref<1x6x1024xf32, #tpu.memory_space<vmem>>, %arg4: memref<1x1x1024xf32, #tpu.memory_space<vmem>>, %arg5: memref<1x1x1024xf32, #tpu.memory_space<vmem>>, %arg6: memref<1x6x1xf32, #tpu.memory_space<vmem>>, %arg7: memref<6x1024xf32, #tpu.memory_space<vmem>>) attributes {dimension_semantics = [#tpu.dimension_semantics<parallel>, #tpu.dimension_semantics<parallel>, #tpu.dimension_semantics<arbitrary>], iteration_bounds = array<i64: 2, 1, 1>, scalar_prefetch = 0 : i64, scratch_operands = 1 : i64, tpu.core_type = #tpu.core_type<tc>, window_params = [{transform_indices = @transform_0, window_bounds = array<i64: 1, 6, 1024>}, {transform_indices = @transform_1, window_bounds = array<i64: 1, 1, 1024>}, {transform_indices = @transform_2, window_bounds = array<i64: 1, 1, 1024>}, {transform_indices = @transform_3, window_bounds = array<i64: 1, 6, 1>}]} {
    %c0_i32 = arith.constant 0 : i32
    %0 = arith.cmpi eq, %arg2, %c0_i32 : i32
    %1 = arith.extui %0 : i1 to i32
    %c0_i32_0 = arith.constant 0 : i32
    %2 = arith.cmpi ne, %1, %c0_i32_0 : i32
    scf.if %2 {
      %cst = arith.constant 0.000000e+00 : f32
      %18 = vector.broadcast %cst : f32 to vector<6x1024xf32>
      %c0_15 = arith.constant 0 : index
      %c0_16 = arith.constant 0 : index
      %19 = vector.load %arg7[%c0_15, %c0_16] : memref<6x1024xf32, #tpu.memory_space<vmem>>, vector<6x1024xf32>
      tpu.vector_store %arg7[%c0_15, %c0_16], %18 {strides = array<i32>} : memref<6x1024xf32, #tpu.memory_space<vmem>>, vector<6x1024xf32>,
    } else {
    }
    %c0 = arith.constant 0 : index
    %c0_1 = arith.constant 0 : index
    %c0_2 = arith.constant 0 : index
    %3 = vector.load %arg3[%c0, %c0_1, %c0_2] : memref<1x6x1024xf32, #tpu.memory_space<vmem>>, vector<1x6x1024xf32>
    %4 = vector.shape_cast %3 : vector<1x6x1024xf32> to vector<6x1024xf32>
    %c0_3 = arith.constant 0 : index
    %c0_4 = arith.constant 0 : index
    %c0_5 = arith.constant 0 : index
    %5 = vector.load %arg4[%c0_3, %c0_4, %c0_5] : memref<1x1x1024xf32, #tpu.memory_space<vmem>>, vector<1x1x1024xf32>
    %6 = vector.shape_cast %5 : vector<1x1x1024xf32> to vector<1x1024xf32>
    %c0_6 = arith.constant 0 : index
    %c0_7 = arith.constant 0 : index
    %c0_8 = arith.constant 0 : index
    %7 = vector.load %arg5[%c0_6, %c0_7, %c0_8] : memref<1x1x1024xf32, #tpu.memory_space<vmem>>, vector<1x1x1024xf32>
    %8 = vector.shape_cast %7 : vector<1x1x1024xf32> to vector<1x1024xf32>
    %9 = arith.mulf %6, %8 : vector<1x1024xf32>
    %10 = vector.broadcast %9 : vector<1x1024xf32> to vector<6x1024xf32>
    %11 = arith.mulf %4, %10 : vector<6x1024xf32>
    %c0_9 = arith.constant 0 : index
    %c0_10 = arith.constant 0 : index
    %12 = vector.load %arg7[%c0_9, %c0_10] : memref<6x1024xf32, #tpu.memory_space<vmem>>, vector<6x1024xf32>
    %13 = arith.addf %12, %11 : vector<6x1024xf32>
    %c0_11 = arith.constant 0 : index
    %c0_12 = arith.constant 0 : index
    %14 = vector.load %arg7[%c0_11, %c0_12] : memref<6x1024xf32, #tpu.memory_space<vmem>>, vector<6x1024xf32>
    tpu.vector_store %arg7[%c0_11, %c0_12], %13 {strides = array<i32>} : memref<6x1024xf32, #tpu.memory_space<vmem>>, vector<6x1024xf32>,
    %c0_i32_13 = arith.constant 0 : i32
    %15 = arith.cmpi eq, %arg2, %c0_i32_13 : i32
    %16 = arith.extui %15 : i1 to i32
    %c0_i32_14 = arith.constant 0 : i32
    %17 = arith.cmpi ne, %16, %c0_i32_14 : i32
    scf.if %17 {
      %c0_15 = arith.constant 0 : index
      %c0_16 = arith.constant 0 : index
      %18 = vector.load %arg7[%c0_15, %c0_16] : memref<6x1024xf32, #tpu.memory_space<vmem>>, vector<6x1024xf32>
      %cst = arith.constant dense<0.000000e+00> : vector<6xf32>
      %19 = vector.multi_reduction <add>, %18, %cst [1] : vector<6x1024xf32> to vector<6xf32>
      %20 = vector.shape_cast %19 : vector<6xf32> to vector<6x1xf32>
      %c0_17 = arith.constant 0 : index
      %c0_18 = arith.constant 0 : index
      %c0_19 = arith.constant 0 : index
      %21 = vector.load %arg6[%c0_17, %c0_18, %c0_19] : memref<1x6x1xf32, #tpu.memory_space<vmem>>, vector<1x6x1xf32>
      %22 = vector.shape_cast %21 : vector<1x6x1xf32> to vector<6x1xf32>
      %23 = vector.shape_cast %20 : vector<6x1xf32> to vector<1x6x1xf32>
      tpu.vector_store %arg6[%c0_17, %c0_18, %c0_19], %23 {strides = array<i32>} : memref<1x6x1xf32, #tpu.memory_space<vmem>>, vector<1x6x1xf32>,
    } else {
    }
    return
  }
  func.func @transform_0(%arg0: i32, %arg1: i32, %arg2: i32) -> (i32, i32, i32) {
    %c1_i32 = arith.constant 1 : i32
    %0 = arith.muli %arg1, %c1_i32 : i32
    %1 = arith.addi %0, %arg2 : i32
    %c0_i32 = arith.constant 0 : i32
    %c0_i32_0 = arith.constant 0 : i32
    return %arg0, %c0_i32, %1 : i32, i32, i32
  }
  func.func @transform_1(%arg0: i32, %arg1: i32, %arg2: i32) -> (i32, i32, i32) {
    %c1_i32 = arith.constant 1 : i32
    %0 = arith.muli %arg1, %c1_i32 : i32
    %1 = arith.addi %0, %arg2 : i32
    %c0_i32 = arith.constant 0 : i32
    %c0_i32_0 = arith.constant 0 : i32
    return %arg0, %c0_i32, %1 : i32, i32, i32
  }
  func.func @transform_2(%arg0: i32, %arg1: i32, %arg2: i32) -> (i32, i32, i32) {
    %c1_i32 = arith.constant 1 : i32
    %0 = arith.muli %arg1, %c1_i32 : i32
    %1 = arith.addi %0, %arg2 : i32
    %c0_i32 = arith.constant 0 : i32
    %c0_i32_0 = arith.constant 0 : i32
    return %arg0, %c0_i32, %1 : i32, i32, i32
  }
  func.func @transform_3(%arg0: i32, %arg1: i32, %arg2: i32) -> (i32, i32, i32) {
    %c1_i32 = arith.constant 1 : i32
    %0 = arith.muli %arg0, %c1_i32 : i32
    %1 = arith.addi %0, %arg1 : i32
    %c0_i32 = arith.constant 0 : i32
    %c0_i32_0 = arith.constant 0 : i32
    %c0_i32_1 = arith.constant 0 : i32
    return %1, %c0_i32, %c0_i32_0 : i32, i32, i32
  }
}

</mosaic_0001>

<bundles_post_ra>
// kernel: custom-call.11
= control target key start
LH: loop header
LB: loop body
LE: loop exit
PB: predicated region body
PF: predicated region fallthrough
CT: control target
= control target key end

     0   :  { %5 = vsyncpa [#allocation4], 0  ;;  %s889_s0 = inlined_call_operand.vmem [shape: f32[2,6,6], index: 0, kind: input, shape index: {}]   ;;  %s890_s1 = inlined_call_operand.vmem [shape: f32[2,6,6], index: 1, kind: output, shape index: {0}]   ;;  %s891_s2 = inlined_call_operand.hbm [shape: s32[2,6], index: 2, kind: output, shape index: {1}]   ;;  %s892_s3 = inlined_call_operand.vmem [shape: s32[2,6], index: 3, kind: output, shape index: {2}]  }
   0x1   :  { %7 = vsyncpa [#allocation4 + $0x1], 0  ;;  %s707_s12 = smov 0   ;;  %s709_s13 = smov 0  }
   0x2   :  { %s711_s14 = smov 0   ;;  %s713_s15 = smov 0  }
   0x3 LB: > { %s728_s16 = sadd.s32 4294967295, %s679_s15   ;;  %s542_s17 = sadd.s32 4294967294, %s679_s15   ;;  %s679_s15 = sphi %s713_s15, %s900_s15   ;;  %s675_s14 = sphi %s711_s14, %s899_s14   ;;  %s671_s13 = sphi %s709_s13, %s898_s13   ;;  %s667_s12 = sphi %s707_s12, %s897_s12  }
   0x4   : > { %s732_s18 = sadd.s32 1, %s679_s15   ;;  %s17_s19 = sshrl.u32 %s679_s15, 3 }
   0x5   : > { %s18_s20 = sshrl.u32 %s732_s18, 3  ;;  %s22_s21 = sadd.s32 1, %s675_s14 }
   0x6   : > { %s19_s22 = ssub.s32 %s17_s19, %s18_s20  ;;  %p32_p0 = scmp.ne.s32.totalorder %s675_s14, %s671_s13 }
   0x7   : > { %p20_p1 = scmp.eq.s32.totalorder %s19_s22, 0  ;;  %p33_p2 = scmp.eq.s32.totalorder %s728_s16, 1 }
   0x8   : > { %p38_p3 = scmp.ne.s32.totalorder %s671_s13, %s667_s12  ;;  %p39_p4 = scmp.eq.s32.totalorder %s542_s17, 1 }
   0x9   : > { %s743_s23 = scalar_select %p20_p1, %s675_s14, %s22_s21  }
   0xa   : > { %p745_p5 = por %p33_p2, %p32_p0  ;;  %p749_p6 = por %p39_p4, %p38_p3 }
   0xb   : > { %p544_p7 = scmp.ge.s32.totalorder %s679_s15, 2 }
   0xc   : > { %s85_s26 = sand.u32 (!%p544_p7), 1, %s679_s15   ;;  %s546_s27 = sshll.u32 (!%p544_p7), %s679_s15, 3 }
   0xd   : > { %83 = sbr.rel (%p544_p7) target bundleno = 20 (0x14), region = 16  ;;  %s545_s28 = sshll.u32 (!%p544_p7), %s85_s26, 3 }
   0xe   : > { %s89_s4 = scalar_lea.vmem (!%p544_p7), %s889_s0, %s546_s27  ;;  %s87_s5 = scalar_lea.vmem (!%p544_p7), [#allocation0], %s545_s28 }
   0xf   : > { %v117_v0 = vld [vmem:[%s89_s4] sm:$0xff] (!%p544_p7) }
  0x10   : > { %118 = vst [vmem:[%s87_s5] sm:$0xff] (!%p544_p7), %v117_v0 }
  0x14 PF: > { %p547_p8 = scmp.ge.s32.totalorder %s679_s15, 1  ;;  %p123_p9 = scmp.lt.s32.totalorder %s679_s15, 3 }
  0x16   : > { %p124_p10 = pnand %p547_p8, %p123_p9 }
  0x18   : > { %127 = sbr.rel (%p124_p10) target bundleno = 441 (0x1b9), region = 54 }
  0x1f   : > { %s130_s6 = sand.u32 1, %s728_s16   ;;  %s145_s7 = sand.u32 1, %s671_s13   ;;  %v163_v1 = vlaneseq  ;;  %v685_v4 = vmov 0  }
  0x20   : > { %s548_s8 = sshll.u32 %s130_s6, 3  ;;  %s767_s9 = sshll.u32 %s145_s7, 1 }
  0x21   : > { %v770_v2 = vshrl.u32 %v163_v1, 7  ;;  %s132_s10 = scalar_lea.vmem [#allocation0], %s548_s8  ;;  %s772_s11 = scalar_lea.vmem [#allocation1], %s548_s8 }
  0x22   : > { %v156_v3 = vld [vmem:[%s132_s10] sm:$0xff]  ;;  %s158_s17 = sand.u32 7, %s728_s16   ;;  %s147_s20 = scalar_lea.vmem [#allocation3], %s767_s9 }
  0x23   : > { %157 = vst [vmem:[%s772_s11] sm:$0xff] %v156_v3  ;;  %167 = vst [vmem:[#allocation7] sm:$0xff] %v770_v2  ;;  %s777_s19 = scalar_lea.vmem [#allocation2], %s158_s17  ;;  %s153_s21 = scalar_lea.vmem [#allocation6], %s767_s9 }
  0x24   : > { %162 = vst [vmem:[%s777_s19] sm:$0x1] %v685_v4  ;;  %s782_s22 = scalar_lea.vmem [#allocation5], %s158_s17  ;;  %s784_s26 = smov 0  }
  0x25 LB: >> { %vm183_vm0 = vcmp.lt.s32.totalorder %v770_v2, 6  ;;  %v792_v7 = vstv %s683_s26  ;;  %s224_s27 = ssub.s32 128, %s683_s26  ;;  %v230_v37 = vand.u32 127, %v163_v1  ;;  %s236_s28 = scalar_lea.vmem %s772_s11, %s683_s26 [#allocation1]  ;;  %s683_s26 = sphi %s784_s26, %s173_s26  }
  0x26   : >> { %vm182_vm1 = vcmp.ge.s32.totalorder %v770_v2, %v792_v7  ;;  %s242_s30 = scalar_lea.vmem [#allocation7], %s683_s26  ;;  %vm262_vm15 = vcmp.gt.s32.totalorder %v770_v2, %v792_v7  ;;  %s173_s26 = sadd.s32 1, %s683_s26  }
  0x27   : >> { %vm184_vm3 = vmand %vm182_vm1, %vm183_vm0  ;;  %vm254_vm12 = vcmp.gt.s32.totalorder %v230_v37, %v792_v7  ;;  %vm231_vm13 = vcmp.eq.s32.totalorder %v230_v37, %v792_v7  ;;  %p170_p11 = scmp.ge.s32.totalorder %s173_s26, 6  }
  0x28   : >> { %vm266_vm1 = vmand %vm262_vm15, %vm231_vm13  ;;  %s893_s6 = sshrl.u32 (%p170_p11), %s728_s16, 3  ;;  %s556_s8 = sshll.u32 (%p170_p11), %s728_s16, 3 }
  0x29   : > { %s557_s10 = sshll.u32 (%p170_p11), %s893_s6, 5  ;;  %s686_s6 = smov (%p170_p11), [#allocation3]  }
  0x2a   : >> { %v178_v5 = vld [vmem:[%s772_s11] sm:$0xff]  ;;  %v238_v40 = vld [vmem:[%s236_s28] ss:$0 sm:$0xff]  ;;  %s617_s17 = sshll.u32 (%p170_p11), %s686_s6, 4  ;;  %s618_s17 = int_to_ptr.vmem [resolvable:$false] %s617_s17 }
  0x2b   : >> { %v179_v6 = vand.u32 2147483647, %v178_v5  ;;  %v233_v39 = vld [vmem:[%s777_s19] ss:$0 sm:$0xff] }
  0x2c   : >> { %v244_v41 = vld [vmem:[%s242_s30] ss:$0 sm:$0xff] }
  0x2d   : >> { %vm552_vm2 = vcmp.gt.f32.partialorder %v179_v6, -inf }
  0x2e   : >> { %vm186_vm4 = vmand %vm184_vm3, %vm552_vm2 }
  0x2f   : >> { %v187_v8 = vsel %vm186_vm4, %v770_v2, %v792_v7  ;;  %v188_v9 = vsel %vm186_vm4, %v179_v6, -inf }
  0x30   : >> { %v189_v10 = vrot.slane %v188_v9, 1  ;;  %v190_v11 = vrot.slane %v187_v8, 1 }
  0x32   : >> { %vm191_vm5 = vcmp.ge.f32.partialorder %v189_v10, %v188_v9  ;;  %v194_v12 = vrot.slane %v189_v10, 1  ;;  %v195_v13 = vrot.slane %v190_v11, 1 }
  0x33   : >> { %v192_v14 = vsel %vm191_vm5, %v189_v10, %v188_v9  ;;  %v193_v15 = vsel %vm191_vm5, %v190_v11, %v187_v8 }
  0x34   : >> { %vm196_vm6 = vcmp.ge.f32.partialorder %v194_v12, %v192_v14  ;;  %v199_v16 = vrot.slane %v194_v12, 1  ;;  %v200_v17 = vrot.slane %v195_v13, 1 }
  0x35   : >> { %v197_v18 = vsel %vm196_vm6, %v194_v12, %v192_v14  ;;  %v198_v19 = vsel %vm196_vm6, %v195_v13, %v193_v15 }
  0x36   : >> { %vm201_vm7 = vcmp.ge.f32.partialorder %v199_v16, %v197_v18  ;;  %v204_v20 = vrot.slane %v199_v16, 1  ;;  %v205_v21 = vrot.slane %v200_v17, 1 }
  0x37   : >> { %v202_v22 = vsel %vm201_vm7, %v199_v16, %v197_v18  ;;  %v203_v23 = vsel %vm201_vm7, %v200_v17, %v198_v19 }
  0x38   : >> { %vm206_vm8 = vcmp.ge.f32.partialorder %v204_v20, %v202_v22  ;;  %v209_v24 = vrot.slane %v204_v20, 1  ;;  %v210_v25 = vrot.slane %v205_v21, 1 }
  0x39   : >> { %v207_v26 = vsel %vm206_vm8, %v204_v20, %v202_v22  ;;  %v208_v27 = vsel %vm206_vm8, %v205_v21, %v203_v23 }
  0x3a   : >> { %vm211_vm9 = vcmp.ge.f32.partialorder %v209_v24, %v207_v26  ;;  %v214_v28 = vrot.slane %v209_v24, 1  ;;  %v215_v29 = vrot.slane %v210_v25, 1 }
  0x3b   : >> { %v212_v30 = vsel %vm211_vm9, %v209_v24, %v207_v26  ;;  %v213_v31 = vsel %vm211_vm9, %v210_v25, %v208_v27 }
  0x3c   : >> { %vm216_vm10 = vcmp.ge.f32.partialorder %v214_v28, %v212_v30  ;;  %v219_v32 = vrot.slane %v214_v28, 1  ;;  %v220_v33 = vrot.slane %v215_v29, 1 }
  0x3d   : >> { %v217_v34 = vsel %vm216_vm10, %v214_v28, %v212_v30  ;;  %v218_v35 = vsel %vm216_vm10, %v215_v29, %v213_v31 }
  0x3e   : >> { %vm221_vm11 = vcmp.ge.f32.partialorder %v219_v32, %v217_v34 }
  0x3f   : >> { %v223_v36 = vsel %vm221_vm11, %v220_v33, %v218_v35 }
  0x40   : >> { %225 = vrot.lane.b32.xlu0 %v223_v36, %s224_s27 }
  0xb2   : >> { %v226_v38 = vpop.permute.xlu0 %225 }
  0xb3   : >> { %561 = vpush %v226_v38 }
  0xe4   : >> { %s562_s29 = spop %561 }
  0xe5   : >> { %v232_v42 = vstv %s562_s29  ;;  %s237_s4 = scalar_lea.vmem %s772_s11, %s562_s29 [#allocation1]  ;;  %s243_s5 = scalar_lea.vmem [#allocation7], %s562_s29 }
  0xe6   : >> { %v239_v43 = vld [vmem:[%s237_s4] ss:$0 sm:$0xff]  ;;  %v234_v45 = vsel %vm231_vm13, %v232_v42, %v233_v39  ;;  %s836_s29 = scalar_lea.hbm (%p170_p11), %s891_s2, %s557_s10 }
  0xe7   : >> { %v245_v44 = vld [vmem:[%s243_s5] ss:$0 sm:$0xff]  ;;  %240 = vst [vmem:[%s237_s4] sm:$0x1] %v238_v40  ;;  %vm248_vm14 = vcmp.ne.f32.partialorder %v239_v43, 0.0  ;;  %235 = vst [vmem:[%s777_s19] sm:$0x1] %v234_v45  ;;  %v255_v52 = vsel %vm254_vm12, %v239_v43, 0.0  ;;  %s348_s19 = scalar_lea.vmem (%p170_p11), %s890_s1, %s556_s8 }
  0xe8   : >> { %246 = vst [vmem:[%s243_s5] sm:$0x1] %v244_v41  ;;  %241 = vst [vmem:[%s236_s28] sm:$0x1] %v239_v43  ;;  %s339_s4 = scalar_lea.sflag (%p170_p11), [#allocation4], %s145_s7 }
  0xe9   : >> { %247 = vst [vmem:[%s242_s30] sm:$0x1] %v245_v44  ;;  %vm249_vm0 = vmand %vm231_vm13, %vm248_vm14  ;;  %s391_s30 = sshll.u32 (%p170_p11), %s147_s20, 4  ;;  %s392_s30 = int_to_ptr.vmem [resolvable:$true] %s391_s30 }
  0xea   : >> { %v250_v46 = vsel %vm249_vm0, %v239_v43, 1.0  ;;  %s613_s5 = scalar_lea.vmem (%p170_p11), %s392_s30, 32  ;;  %p620_p1 = scmp.lt.s32.totalorder (%p170_p11), %s392_s30, %s618_s17 }
  0xeb   : >> { %v263_v47 = vsel %vm262_vm15, %v250_v46, 1.0  ;;  %p614_p12 = scmp.ne.s32.totalorder (%p170_p11), %s392_s30, %s613_s5 }
  0xec   : >> { %611 = vrcp.f32 %v263_v47 }
  0xed   : > { %p615_p13 = pnand (%p170_p11), %p614_p12, %p745_p5 }
  0xee   : > { %v325_v57 = vld [vmem:[#allocation2] sm:$0x3] (%p170_p11) }
  0xef   : >> { %v259_v49 = vld [vmem:[%s772_s11] sm:$0xff]  ;;  %327 = vst [vmem:[%s147_s20] sm:$0x3] (%p170_p11), %v325_v57  ;;  %p616_p0 = pneg (%p170_p11), %p615_p13 }
  0xf0   : > { %v273_v56 = vld [vmem:[#allocation7] sm:$0xff] (%p170_p11) }
  0xf6   : >> { %v612_v48 = vpop.eup %611 }
  0xf7   : >> { %v265_v50 = vmul.f32 %v612_v48, %v259_v49 }
  0xf9   : >> { %v267_v51 = vsel %vm266_vm1, %v265_v50, 0.0 }
  0xfa   : >> { %268 = vadd.xlane.f32.xlu0 %v267_v51 }
 0x127   : > { %289 = vxpose.xlu0.b32.start.end [1/1] (short) (narrow) (%p170_p11), %v273_v56, 8 }
 0x186   : > { %172 = sbr.rel (!%p170_p11) target bundleno = 37 (0x25), region = 210 }
 0x187   : >> { %v269_v53 = vpop.xlane.xlu0 %268 }
 0x188   : >> { %v270_v54 = vmul.f32 %v269_v53, %v255_v52 }
 0x18a   : >> { %v271_v55 = vsub.f32 %v265_v50, %v270_v54 }
 0x18c   : >> { %272 = vst [vmem:[%s772_s11] sm:$0xff] %v271_v55 }
 0x193   : > { %v376_v58 = vld [vmem:[%s772_s11] sm:$0xff]  ;;  %s619_s11 = scalar_lea.vmem %s618_s17, 64 }
 0x194   : > { %377 = vst [vmem:[%s348_s19] sm:$0xff] %v376_v58  ;;  %p621_p2 = scmp.lt.s32.totalorder %s619_s11, %s613_s5 }
 0x196   : > { %p622_p3 = por %p621_p2, %p620_p1 }
 0x198   : > { %p623_p4 = pnand %p622_p3, %p616_p0 }
 0x19a   : > { %626 = shalt.err (!%p623_p4)
}
 0x19b   : > { %s627_s7 = scalar_lea.hbm %s836_s29, 32  ;;  %s631_s6 = scalar_lea.hbm %s891_s2, 32 }
 0x19c   : > { %p628_p8 = scmp.ne.s32.totalorder %s836_s29, %s627_s7  ;;  %p632_p11 = scmp.lt.u32.totalorder %s836_s29, %s891_s2 }
 0x19d   : > { %p633_p12 = scmp.lt.u32.totalorder %s631_s6, %s627_s7  ;;  %p635_p0 = scmp.lt.u32.totalorder %s627_s7, %s836_s29 }
 0x19e   : > { %p629_p9 = pnand %p628_p8, %p745_p5 }
 0x19f   : > { %p634_p13 = por %p633_p12, %p632_p11 }
 0x1a0   : > { %p630_p10 = pneg %p629_p9 }
 0x1a1   : > { %p636_p1 = por %p635_p0, %p634_p13 }
 0x1a3   : > { %p637_p2 = pnand %p636_p1, %p630_p10 }
 0x1a5   : > { %640 = shalt.err (!%p637_p2)
}
 0x1a6   : > { %563 = dma.vmem_to_hbm [thread:$0]  (%p745_p5), %s392_s30, 32, %s836_s29, %s339_s4  }
 0x1a7   : > { %v305_v59 = vpop.trf.xlu0  ;;  %s896_s19 = sshrl.u32 (%p745_p5), %s728_s16, 3 }
 0x1a8   : > { %321 = vst [vmem:[%s782_s22] sm:$0x1] %v305_v59  ;;  %s558_s27 = sshll.u32 (%p745_p5), %s896_s19, 1 }
 0x1a9   : > { %s400_s17 = scalar_lea.vmem (%p745_p5), %s892_s3, %s558_s27 }
 0x1aa   : > { %397 = sbr.rel (!%p745_p5) target bundleno = 441 (0x1b9), region = 104 }
 0x1af   : > { %v331_v60 = vld [vmem:[#allocation5] sm:$0x3] }
 0x1b0   : > { %333 = vst [vmem:[%s153_s21] sm:$0x3] %v331_v60 }
 0x1b7   : > { %v416_v61 = vld [vmem:[%s153_s21] sm:$0x3] }
 0x1b8   : > { %417 = vst [vmem:[%s400_s17] sm:$0x3] %v416_v61 }
 0x1b9 PF: > { %s444_s22 = sand.u32 1, %s667_s12   ;;  %p566_p5 = pnand %p544_p7, %p749_p6 }
 0x1ba   : > { %s445_s24 = scalar_lea.sflag [#allocation4], %s444_s22 }
 0x1bb   : > { %662 = dma.done.wait (!%p566_p5), %s445_s24, 32  }
 0x1bc   : > { %664 = vsyncadd (!%p566_p5), %s445_s24, 4294967264  ;;  %p10_p3 = scmp.ge.s32.totalorder %s732_s18, 4   ;;  %s897_s12 = smov %s671_s13 }
 0x1bd   : > { %s898_s13 = smov %s675_s14  ;;  %s899_s14 = smov %s743_s23 }
 0x1be   : > { %s900_s15 = smov %s732_s18  ;;  %12 = sbr.rel (!%p10_p3) target bundleno = 3 (0x3), region = 221 }
 0x1c5   :  { %457 = vsyncpa [#allocation4], 1 }
 0x1c6   :  { %459 = vsyncpa [#allocation4 + $0x1], 1 }

// kernel: custom-call.13
= control target key start
LH: loop header
LB: loop body
LE: loop exit
PB: predicated region body
PF: predicated region fallthrough
CT: control target
= control target key end

     0   :  { %s365_s6 = smov 0   ;;  %s367_s7 = smov 0   ;;  %s405_s0 = inlined_call_operand.vmem [shape: f32[2,1,6,6], index: 0, kind: input, shape index: {}]   ;;  %s406_s1 = inlined_call_operand.vmem [shape: f32[2,1,6,6], index: 1, kind: output, shape index: {}]  }
   0x1   :  { %s369_s8 = smov 0  }
   0x2 LB: > { %s291_s9 = sadd.s32 4294967295, %s352_s8   ;;  %s33_s10 = sadd.s32 1, %s348_s7  ;;  %s352_s8 = sphi %s369_s8, %s7_s8   ;;  %s348_s7 = sphi %s367_s7, %s408_s7   ;;  %s344_s6 = sphi %s365_s6, %s407_s6  }
   0x3   : > { %p35_p0 = scmp.ge.s32.totalorder %s33_s10, 2  ;;  %p293_p1 = scmp.ge.s32.totalorder %s352_s8, 2 }
   0x4   : > { %s49_s11 = sand.u32 (!%p293_p1), 1, %s352_s8   ;;  %s295_s12 = sshll.u32 (!%p293_p1), %s348_s7, 3 }
   0x5   : > { %s410_s10 = smov (%p35_p0, %s33_s10), 0  ;;  %47 = sbr.rel (%p293_p1) target bundleno = 12 (0xc), region = 16 }
   0x6   : > { %s294_s13 = sshll.u32 (!%p293_p1), %s49_s11, 3  ;;  %s56_s16 = scalar_lea.vmem (!%p293_p1), %s405_s0, %s295_s12 }
   0x7   : > { %v84_v0 = vld [vmem:[%s56_s16] sm:$0xff] (!%p293_p1)  ;;  %s51_s17 = scalar_lea.vmem (!%p293_p1), [#allocation0], %s294_s13 }
   0x8   : > { %85 = vst [vmem:[%s51_s17] sm:$0xff] (!%p293_p1), %v84_v0 }
   0xc PF: > { %p296_p2 = scmp.ge.s32.totalorder %s352_s8, 1  ;;  %p90_p3 = scmp.lt.s32.totalorder %s352_s8, 3 }
   0xe   : > { %p91_p4 = pnand %p296_p2, %p90_p3 }
  0x10   : > { %94 = sbr.rel (%p91_p4) target bundleno = 923 (0x39b), region = 54 }
  0x17   : > { %s97_s18 = sand.u32 1, %s291_s9   ;;  %v108_v1 = vlaneseq  ;;  %v354_v10 = vmov -1.0   ;;  %s300_s21 = sshll.u32 %s344_s6, 3 }
  0x18   : > { %s297_s19 = sshll.u32 %s97_s18, 3  ;;  %s199_s24 = scalar_lea.vmem %s406_s1, %s300_s21 }
  0x19   : > { %v109_v2 = vand.u32 127, %v108_v1  ;;  %v112_v3 = vshrl.u32 %v108_v1, 7  ;;  %s99_s20 = scalar_lea.vmem [#allocation0], %s297_s19 }
  0x1a   : > { %v115_v4 = vld [vmem:[%s99_s20] sm:$0xff] }
  0x1b   : > { %vm110_vm0 = vcmp.lt.s32.totalorder %v109_v2, 6  ;;  %vm114_vm1 = vcmp.eq.s32.totalorder %v112_v3, %v109_v2  ;;  %vm119_vm2 = vcmp.ge.s32.totalorder %v112_v3, %v109_v2  ;;  %vm133_vm4 = vcmp.eq.s32.totalorder %v109_v2, 0 }
  0x1c   : > { %v116_v5 = vsel %vm114_vm1, %v115_v4, 0.0  ;;  %vm120_vm3 = vmand %vm119_vm2, %vm110_vm0  ;;  %vm130_vm5 = vcmp.eq.s32.totalorder %v109_v2, %v112_v3  ;;  %v134_v11 = vsel %vm133_vm4, 1.0, %v354_v10  ;;  %vm141_vm6 = vcmp.eq.s32.totalorder %v109_v2, 1 }
  0x1d   : > { %v121_v6 = vsel %vm120_vm3, %v115_v4, 0.0  ;;  %117 = vadd.xlane.f32.xlu0 %v116_v5  ;;  %v135_v12 = vsel %vm130_vm5, %v134_v11, 0.0  ;;  %vm151_vm7 = vcmp.eq.s32.totalorder %v109_v2, 2  ;;  %vm161_vm8 = vcmp.eq.s32.totalorder %v109_v2, 3 }
  0x1e   : > { %vm171_vm9 = vcmp.eq.s32.totalorder %v109_v2, 4  ;;  %vm181_vm10 = vcmp.eq.s32.totalorder %v109_v2, 5 }
  0xaa   : > { %v118_v7 = vpop.xlane.xlu0 %117 }
  0xab   : > { %328 = vrcp.f32 %v118_v7  ;;  %vm188_vm11 = vweird.f32 %v118_v7 }
  0xb5   : > { %v329_v8 = vpop.eup %328 }
  0xb6   : > { %v123_v9 = vmul.f32 %v329_v8, %v121_v6 }
  0xb8   : > { %124 = vst [vmem:[#allocation2] sm:$0xff] %v123_v9 }
  0xbf   : > { %v137_v13 = vld [vmem:[#allocation2 + $0x1] ss:$0 sm:$0xff]  ;;  %v147_v16 = vld [vmem:[#allocation2 + $0x2] ss:$0 sm:$0xff]  ;;  %v157_v21 = vld [vmem:[#allocation2 + $0x3] ss:$0 sm:$0xff] }
  0xc0   : > { %v138_v14 = vxor.u32 2147483648, %v137_v13  ;;  %v148_v18 = vxor.u32 2147483648, %v147_v16  ;;  %v158_v23 = vxor.u32 2147483648, %v157_v21  ;;  %v167_v26 = vld [vmem:[#allocation2 + $0x4] ss:$0 sm:$0xff] }
  0xc1   : > { %v168_v28 = vxor.u32 2147483648, %v167_v26  ;;  %v177_v31 = vld [vmem:[#allocation2 + $0x5] ss:$0 sm:$0xff] }
  0xc2   : > { %v142_v15 = vmul.f32 %v138_v14, %v135_v12  ;;  %v178_v33 = vxor.u32 2147483648, %v177_v31 }
  0xc4   : > { %143 = vadd.xlane.f32.xlu0 %v142_v15 }
 0x151   : > { %v144_v17 = vpop.xlane.xlu0 %143 }
 0x152   : > { %v145_v19 = vsel %vm141_vm6, %v144_v17, %v135_v12 }
 0x153   : > { %v152_v20 = vmul.f32 %v148_v18, %v145_v19 }
 0x155   : > { %153 = vadd.xlane.f32.xlu1 %v152_v20 }
 0x1e2   : > { %v154_v22 = vpop.xlane.xlu1 %153 }
 0x1e3   : > { %v155_v24 = vsel %vm151_vm7, %v154_v22, %v145_v19 }
 0x1e4   : > { %v162_v25 = vmul.f32 %v158_v23, %v155_v24 }
 0x1e6   : > { %163 = vadd.xlane.f32.xlu1 %v162_v25 }
 0x273   : > { %v164_v27 = vpop.xlane.xlu1 %163 }
 0x274   : > { %v165_v29 = vsel %vm161_vm8, %v164_v27, %v155_v24 }
 0x275   : > { %v172_v30 = vmul.f32 %v168_v28, %v165_v29 }
 0x277   : > { %173 = vadd.xlane.f32.xlu0 %v172_v30 }
 0x304   : > { %v174_v32 = vpop.xlane.xlu0 %173 }
 0x305   : > { %v175_v34 = vsel %vm171_vm9, %v174_v32, %v165_v29 }
 0x306   : > { %v182_v35 = vmul.f32 %v178_v33, %v175_v34 }
 0x308   : > { %183 = vadd.xlane.f32.xlu1 %v182_v35 }
 0x395   : > { %v184_v36 = vpop.xlane.xlu1 %183 }
 0x396   : > { %v185_v37 = vsel %vm181_vm10, %v184_v36, %v175_v34 }
 0x397   : > { %v187_v38 = vmul.f32 %v329_v8, %v185_v37 }
 0x399   : > { %v189_v39 = vsel %vm188_vm11, %v185_v37, %v187_v38 }
 0x39a   : > { %228 = vst [vmem:[%s199_s24] sm:$0xff] %v189_v39 }
 0x39b PF: > { %s7_s8 = sadd.s32 1, %s352_s8   ;;  %s407_s6 = smov %s348_s7 }
 0x39c   : > { %p4_p5 = scmp.ge.s32.totalorder %s7_s8, 4   ;;  %s408_s7 = smov %s410_s10 }
 0x39e   :  { %6 = sbr.rel (!%p4_p5) target bundleno = 2 (0x2), region = 123 }

// kernel: custom-call.12
= control target key start
LH: loop header
LB: loop body
LE: loop exit
PB: predicated region body
PF: predicated region fallthrough
CT: control target
= control target key end

     0   :  { %s364_s6 = smov 0   ;;  %s366_s7 = smov 0   ;;  %s404_s0 = inlined_call_operand.vmem [shape: f32[2,1,6,6], index: 0, kind: input, shape index: {}]   ;;  %s405_s1 = inlined_call_operand.vmem [shape: f32[2,1,6,6], index: 1, kind: output, shape index: {}]  }
   0x1   :  { %s368_s8 = smov 0  }
   0x2 LB: > { %s290_s9 = sadd.s32 4294967295, %s351_s8   ;;  %s33_s10 = sadd.s32 1, %s347_s7  ;;  %s351_s8 = sphi %s368_s8, %s7_s8   ;;  %s347_s7 = sphi %s366_s7, %s407_s7   ;;  %s343_s6 = sphi %s364_s6, %s406_s6  }
   0x3   : > { %p35_p0 = scmp.ge.s32.totalorder %s33_s10, 2  ;;  %p292_p1 = scmp.ge.s32.totalorder %s351_s8, 2 }
   0x4   : > { %s49_s11 = sand.u32 (!%p292_p1), 1, %s351_s8   ;;  %s294_s12 = sshll.u32 (!%p292_p1), %s347_s7, 3 }
   0x5   : > { %s409_s10 = smov (%p35_p0, %s33_s10), 0  ;;  %47 = sbr.rel (%p292_p1) target bundleno = 12 (0xc), region = 16 }
   0x6   : > { %s293_s13 = sshll.u32 (!%p292_p1), %s49_s11, 3  ;;  %s56_s16 = scalar_lea.vmem (!%p292_p1), %s404_s0, %s294_s12 }
   0x7   : > { %v84_v0 = vld [vmem:[%s56_s16] sm:$0xff] (!%p292_p1)  ;;  %s51_s17 = scalar_lea.vmem (!%p292_p1), [#allocation0], %s293_s13 }
   0x8   : > { %85 = vst [vmem:[%s51_s17] sm:$0xff] (!%p292_p1), %v84_v0 }
   0xc PF: > { %p295_p2 = scmp.ge.s32.totalorder %s351_s8, 1  ;;  %p90_p3 = scmp.lt.s32.totalorder %s351_s8, 3 }
   0xe   : > { %p91_p4 = pnand %p295_p2, %p90_p3 }
  0x10   : > { %94 = sbr.rel (%p91_p4) target bundleno = 923 (0x39b), region = 54 }
  0x17   : > { %s97_s18 = sand.u32 1, %s290_s9   ;;  %v108_v1 = vlaneseq  ;;  %v353_v10 = vmov -1.0   ;;  %s299_s21 = sshll.u32 %s343_s6, 3 }
  0x18   : > { %s296_s19 = sshll.u32 %s97_s18, 3  ;;  %s198_s24 = scalar_lea.vmem %s405_s1, %s299_s21 }
  0x19   : > { %v109_v2 = vand.u32 127, %v108_v1  ;;  %v112_v3 = vshrl.u32 %v108_v1, 7  ;;  %s99_s20 = scalar_lea.vmem [#allocation0], %s296_s19 }
  0x1a   : > { %v115_v4 = vld [vmem:[%s99_s20] sm:$0xff] }
  0x1b   : > { %vm110_vm0 = vcmp.lt.s32.totalorder %v109_v2, 6  ;;  %vm114_vm1 = vcmp.eq.s32.totalorder %v112_v3, %v109_v2  ;;  %vm119_vm2 = vcmp.le.s32.totalorder %v112_v3, %v109_v2  ;;  %vm133_vm4 = vcmp.eq.s32.totalorder %v109_v2, 5 }
  0x1c   : > { %v116_v5 = vsel %vm114_vm1, %v115_v4, 0.0  ;;  %vm120_vm3 = vmand %vm119_vm2, %vm110_vm0  ;;  %vm130_vm5 = vcmp.eq.s32.totalorder %v109_v2, %v112_v3  ;;  %v134_v11 = vsel %vm133_vm4, 1.0, %v353_v10  ;;  %vm141_vm6 = vcmp.eq.s32.totalorder %v109_v2, 4 }
  0x1d   : > { %v121_v6 = vsel %vm120_vm3, %v115_v4, 0.0  ;;  %117 = vadd.xlane.f32.xlu0 %v116_v5  ;;  %v135_v12 = vsel %vm130_vm5, %v134_v11, 0.0  ;;  %vm151_vm7 = vcmp.eq.s32.totalorder %v109_v2, 3  ;;  %vm161_vm8 = vcmp.eq.s32.totalorder %v109_v2, 2 }
  0x1e   : > { %vm171_vm9 = vcmp.eq.s32.totalorder %v109_v2, 1  ;;  %vm180_vm10 = vcmp.eq.s32.totalorder %v109_v2, 0 }
  0xaa   : > { %v118_v7 = vpop.xlane.xlu0 %117 }
  0xab   : > { %327 = vrcp.f32 %v118_v7  ;;  %vm187_vm11 = vweird.f32 %v118_v7 }
  0xb5   : > { %v328_v8 = vpop.eup %327 }
  0xb6   : > { %v123_v9 = vmul.f32 %v328_v8, %v121_v6 }
  0xb8   : > { %124 = vst [vmem:[#allocation2] sm:$0xff] %v123_v9 }
  0xbf   : > { %v137_v13 = vld [vmem:[#allocation2 + $0x4] ss:$0 sm:$0xff]  ;;  %v147_v16 = vld [vmem:[#allocation2 + $0x3] ss:$0 sm:$0xff]  ;;  %v157_v21 = vld [vmem:[#allocation2 + $0x2] ss:$0 sm:$0xff] }
  0xc0   : > { %v138_v14 = vxor.u32 2147483648, %v137_v13  ;;  %v148_v18 = vxor.u32 2147483648, %v147_v16  ;;  %v158_v23 = vxor.u32 2147483648, %v157_v21  ;;  %v167_v26 = vld [vmem:[#allocation2 + $0x1] ss:$0 sm:$0xff] }
  0xc1   : > { %v168_v28 = vxor.u32 2147483648, %v167_v26  ;;  %v176_v31 = vld [vmem:[#allocation2] ss:$0 sm:$0xff] }
  0xc2   : > { %v142_v15 = vmul.f32 %v138_v14, %v135_v12  ;;  %v177_v33 = vxor.u32 2147483648, %v176_v31 }
  0xc4   : > { %143 = vadd.xlane.f32.xlu0 %v142_v15 }
 0x151   : > { %v144_v17 = vpop.xlane.xlu0 %143 }
 0x152   : > { %v145_v19 = vsel %vm141_vm6, %v144_v17, %v135_v12 }
 0x153   : > { %v152_v20 = vmul.f32 %v148_v18, %v145_v19 }
 0x155   : > { %153 = vadd.xlane.f32.xlu1 %v152_v20 }
 0x1e2   : > { %v154_v22 = vpop.xlane.xlu1 %153 }
 0x1e3   : > { %v155_v24 = vsel %vm151_vm7, %v154_v22, %v145_v19 }
 0x1e4   : > { %v162_v25 = vmul.f32 %v158_v23, %v155_v24 }
 0x1e6   : > { %163 = vadd.xlane.f32.xlu1 %v162_v25 }
 0x273   : > { %v164_v27 = vpop.xlane.xlu1 %163 }
 0x274   : > { %v165_v29 = vsel %vm161_vm8, %v164_v27, %v155_v24 }
 0x275   : > { %v172_v30 = vmul.f32 %v168_v28, %v165_v29 }
 0x277   : > { %173 = vadd.xlane.f32.xlu0 %v172_v30 }
 0x304   : > { %v174_v32 = vpop.xlane.xlu0 %173 }
 0x305   : > { %v175_v34 = vsel %vm171_vm9, %v174_v32, %v165_v29 }
 0x306   : > { %v181_v35 = vmul.f32 %v177_v33, %v175_v34 }
 0x308   : > { %182 = vadd.xlane.f32.xlu1 %v181_v35 }
 0x395   : > { %v183_v36 = vpop.xlane.xlu1 %182 }
 0x396   : > { %v184_v37 = vsel %vm180_vm10, %v183_v36, %v175_v34 }
 0x397   : > { %v186_v38 = vmul.f32 %v328_v8, %v184_v37 }
 0x399   : > { %v188_v39 = vsel %vm187_vm11, %v184_v37, %v186_v38 }
 0x39a   : > { %227 = vst [vmem:[%s198_s24] sm:$0xff] %v188_v39 }
 0x39b PF: > { %s7_s8 = sadd.s32 1, %s351_s8   ;;  %s406_s6 = smov %s347_s7 }
 0x39c   : > { %p4_p5 = scmp.ge.s32.totalorder %s7_s8, 4   ;;  %s407_s7 = smov %s409_s10 }
 0x39e   :  { %6 = sbr.rel (!%p4_p5) target bundleno = 2 (0x2), region = 122 }

// kernel: neg.0
= control target key start
LH: loop header
LB: loop body
LE: loop exit
PB: predicated region body
PF: predicated region fallthrough
CT: control target
= control target key end

     0   :  { %s24_s0 = inlined_call_operand.vmem [shape: f32[2,3], index: 0, kind: input, shape index: {}]   ;;  %s25_s1 = inlined_call_operand.vmem [shape: f32[2,3], index: 1, kind: output, shape index: {}]  }
   0x1   :  { %v2_v0 = vld [vmem:[%s24_s0] sm:$0x3] }
   0x2   :  { %v5_v1 = vxor.u32 2147483648, %v2_v0 }
   0x4   :  { %7 = vst [vmem:[%s25_s1] sm:$0x3] %v5_v1 }

// kernel: direct_solver_forward.1
= control target key start
LH: loop header
LB: loop body
LE: loop exit
PB: predicated region body
PF: predicated region fallthrough
CT: control target
= control target key end

     0   :  { %s610_s12 = smov 0   ;;  %s612_s13 = smov 0   ;;  %s662_s0 = inlined_call_operand.vmem [shape: f32[2,6,1024], index: 0, kind: input, shape index: {}]   ;;  %s663_s1 = inlined_call_operand.vmem [shape: f32[2,1,1024], index: 1, kind: input, shape index: {}]   ;;  %s664_s2 = inlined_call_operand.vmem [shape: f32[2,1,1024], index: 2, kind: input, shape index: {}]   ;;  %s665_s3 = inlined_call_operand.vmem [shape: f32[2,6,1], index: 3, kind: output, shape index: {}]  }
   0x1   :  { %s614_s14 = smov 0  }
   0x2 LB: > { %s32_s15 = sadd.s32 1, %s583_s13  ;;  %p531_p0 = scmp.ge.s32.totalorder %s587_s14, 1  ;;  %s587_s14 = sphi %s614_s14, %s13_s14   ;;  %s583_s13 = sphi %s612_s13, %s667_s13   ;;  %s579_s12 = sphi %s610_s12, %s666_s12  }
   0x3   : > { %p34_p1 = scmp.ge.s32.totalorder %s32_s15, 2  ;;  %p209_p2 = scmp.lt.s32.totalorder %s587_s14, 3 }
   0x5   : > { %s669_s15 = smov (%p34_p1, %s32_s15), 0  ;;  %p210_p3 = pnand %p531_p0, %p209_p2 }
   0x6   : > { %p258_p4 = scmp.lt.s32.totalorder (!%p210_p3), %s579_s12, 1  ;;  %v320_v0 = vlaneseq (!%p210_p3)  ;;  %v589_v1 = vmov (!%p210_p3), 0.0   ;;  %vm403_vm0 = vcmask (!%p210_p3), 1045504   ;;  %vm421_vm1 = vcmask (!%p210_p3), 5120  }
   0x7   : > { %213 = sbr.rel (%p210_p3) target bundleno = 194 (0xc2), region = 32  ;;  %300 = vst [vmem:[#allocation2] sm:$0x3f] (!%p210_p3), %v589_v1  ;;  %301 = vst [vmem:[#allocation2 + $0x8] sm:$0x3f] (!%p210_p3), %v589_v1 }
   0x8   : > { %302 = vst [vmem:[#allocation2 + $0x10] sm:$0x3f] (!%p210_p3), %v589_v1  ;;  %303 = vst [vmem:[#allocation2 + $0x18] sm:$0x3f] (!%p210_p3), %v589_v1  ;;  %v321_v2 = vshrl.u32 (!%p210_p3), %v320_v0, 7 }
   0x9   : > { %304 = vst [vmem:[#allocation2 + $0x20] sm:$0x3f] (!%p210_p3), %v589_v1  ;;  %305 = vst [vmem:[#allocation2 + $0x28] sm:$0x3f] (!%p210_p3), %v589_v1 }
   0xa   : > { %306 = vst [vmem:[#allocation2 + $0x30] sm:$0x3f] (!%p210_p3), %v589_v1  ;;  %307 = vst [vmem:[#allocation2 + $0x38] sm:$0x3f] (!%p210_p3), %v589_v1  ;;  %v322_v3 = vsub.s32 (!%p210_p3), 0, %v321_v2  ;;  %v326_v5 = vsub.s32 (!%p210_p3), 1, %v321_v2 }
   0xb   : > { %v330_v6 = vsub.s32 (!%p210_p3), 2, %v321_v2  ;;  %v334_v7 = vsub.s32 (!%p210_p3), 3, %v321_v2  ;;  %v338_v8 = vsub.s32 (!%p210_p3), 4, %v321_v2  ;;  %v342_v11 = vsub.s32 (!%p210_p3), 5, %v321_v2 }
   0xc   : > { %v346_v12 = vsub.s32 (!%p210_p3), 6, %v321_v2  ;;  %v350_v13 = vsub.s32 (!%p210_p3), 7, %v321_v2 }
   0xe   : > { %s671_s12 = smov (!%p258_p4, %s579_s12), 1  ;;  %v368_v26 = vld [vmem:[#allocation2] sm:$0x3f]  ;;  %v369_v27 = vld [vmem:[#allocation2 + $0x8] sm:$0x3f] }
   0xf   : > { %s539_s16 = sshll.u32 %s671_s12, 6  ;;  %s628_s17 = sshll.u32 %s671_s12, 3  ;;  %v370_v32 = vld [vmem:[#allocation2 + $0x10] sm:$0x3f]  ;;  %v371_v33 = vld [vmem:[#allocation2 + $0x18] sm:$0x3f] }
  0x10   : > { %s276_s20 = scalar_lea.vmem %s663_s1, %s628_s17  ;;  %s265_s23 = scalar_lea.vmem %s662_s0, %s539_s16  ;;  %v372_v34 = vld [vmem:[#allocation2 + $0x20] sm:$0x3f]  ;;  %v373_v39 = vld [vmem:[#allocation2 + $0x28] sm:$0x3f] }
  0x11   : > { %s287_s26 = scalar_lea.vmem %s664_s2, %s628_s17  ;;  %v316_v4 = vld [vmem:[%s276_s20] sm:$0xff]  ;;  %v309_v14 = vld [vmem:[%s265_s23 + $0x8] sm:$0x3f]  ;;  %v310_v15 = vld [vmem:[%s265_s23 + $0x10] sm:$0x3f]  ;;  %s294_s29 = scalar_lea.vmem %s665_s3, %s628_s17 }
  0x12   : > { %v308_v9 = vld [vmem:[%s265_s23] sm:$0x3f]  ;;  %v311_v16 = vld [vmem:[%s265_s23 + $0x18] sm:$0x3f]  ;;  %v313_v19 = vld [vmem:[%s265_s23 + $0x28] sm:$0x3f] }
  0x13   : > { %v317_v10 = vld [vmem:[%s287_s26] sm:$0xff]  ;;  %v314_v20 = vld [vmem:[%s265_s23 + $0x30] sm:$0x3f]  ;;  %v315_v21 = vld [vmem:[%s265_s23 + $0x38] sm:$0x3f] }
  0x14   : > { %v318_v17 = vmul.f32 %v317_v10, %v316_v4  ;;  %v312_v18 = vld [vmem:[%s265_s23 + $0x20] sm:$0x3f]  ;;  %v374_v40 = vld [vmem:[#allocation2 + $0x30] sm:$0x3f]  ;;  %v375_v41 = vld [vmem:[#allocation2 + $0x38] sm:$0x3f] }
  0x16   : > { %v323_v22 = vrot.slane %v318_v17, %v322_v3  ;;  %v327_v23 = vrot.slane %v318_v17, %v326_v5  ;;  %v331_v24 = vrot.slane %v318_v17, %v330_v6  ;;  %v335_v25 = vrot.slane %v318_v17, %v334_v7 }
  0x17   : > { %v339_v28 = vrot.slane %v318_v17, %v338_v8  ;;  %v343_v29 = vrot.slane %v318_v17, %v342_v11  ;;  %v347_v30 = vrot.slane %v318_v17, %v346_v12  ;;  %v351_v31 = vrot.slane %v318_v17, %v350_v13 }
  0x18   : > { %v360_v35 = vmul.f32 %v323_v22, %v308_v9  ;;  %v361_v36 = vmul.f32 %v327_v23, %v309_v14  ;;  %v362_v37 = vmul.f32 %v331_v24, %v310_v15  ;;  %v363_v38 = vmul.f32 %v335_v25, %v311_v16 }
  0x19   : > { %v364_v42 = vmul.f32 %v339_v28, %v312_v18  ;;  %v365_v43 = vmul.f32 %v343_v29, %v313_v19  ;;  %v366_v44 = vmul.f32 %v347_v30, %v314_v20  ;;  %v367_v45 = vmul.f32 %v351_v31, %v315_v21 }
  0x1a   : > { %v376_v46 = vadd.f32 %v368_v26, %v360_v35  ;;  %v377_v47 = vadd.f32 %v369_v27, %v361_v36  ;;  %v378_v48 = vadd.f32 %v370_v32, %v362_v37  ;;  %v379_v49 = vadd.f32 %v371_v33, %v363_v38 }
  0x1b   : > { %v380_v50 = vadd.f32 %v372_v34, %v364_v42  ;;  %v381_v51 = vadd.f32 %v373_v39, %v365_v43  ;;  %v382_v52 = vadd.f32 %v374_v40, %v366_v44  ;;  %v383_v53 = vadd.f32 %v375_v41, %v367_v45 }
  0x1c   : > { %384 = vst [vmem:[#allocation2] sm:$0x3f] %v376_v46  ;;  %385 = vst [vmem:[#allocation2 + $0x8] sm:$0x3f] %v377_v47 }
  0x1d   : > { %386 = vst [vmem:[#allocation2 + $0x10] sm:$0x3f] %v378_v48  ;;  %387 = vst [vmem:[#allocation2 + $0x18] sm:$0x3f] %v379_v49 }
  0x1e   : > { %388 = vst [vmem:[#allocation2 + $0x20] sm:$0x3f] %v380_v50  ;;  %389 = vst [vmem:[#allocation2 + $0x28] sm:$0x3f] %v381_v51 }
  0x1f   : > { %390 = vst [vmem:[#allocation2 + $0x30] sm:$0x3f] %v382_v52  ;;  %391 = vst [vmem:[#allocation2 + $0x38] sm:$0x3f] %v383_v53 }
  0x23   : > { %v395_v54 = vld [vmem:[#allocation2] sm:$0x3f]  ;;  %v396_v55 = vld [vmem:[#allocation2 + $0x8] sm:$0x3f] }
  0x24   : > { %v397_v56 = vld [vmem:[#allocation2 + $0x10] sm:$0x3f]  ;;  %v398_v57 = vld [vmem:[#allocation2 + $0x18] sm:$0x3f]  ;;  %v404_v58 = vsel %vm403_vm0, %v395_v54, 0.0  ;;  %v405_v59 = vsel %vm403_vm0, %v396_v55, 0.0 }
  0x25   : > { %v399_v60 = vld [vmem:[#allocation2 + $0x20] sm:$0x3f]  ;;  %v406_v61 = vadd.f32 %v405_v59, %v404_v58  ;;  %v407_v62 = vsel %vm403_vm0, %v397_v56, 0.0  ;;  %v409_v63 = vsel %vm403_vm0, %v398_v57, 0.0  ;;  %v400_v0 = vld [vmem:[#allocation2 + $0x28] sm:$0x3f] }
  0x26   : > { %v411_v2 = vsel %vm403_vm0, %v399_v60, 0.0  ;;  %v401_v3 = vld [vmem:[#allocation2 + $0x30] sm:$0x3f]  ;;  %v413_v5 = vsel %vm403_vm0, %v400_v0, 0.0  ;;  %v402_v6 = vld [vmem:[#allocation2 + $0x38] sm:$0x3f] }
  0x27   : > { %v408_v1 = vadd.f32 %v407_v62, %v406_v61  ;;  %v415_v8 = vsel %vm403_vm0, %v401_v3, 0.0  ;;  %v417_v10 = vsel %vm403_vm0, %v402_v6, 0.0 }
  0x29   : > { %v410_v4 = vadd.f32 %v409_v63, %v408_v1 }
  0x2b   : > { %v412_v7 = vadd.f32 %v411_v2, %v410_v4 }
  0x2d   : > { %v414_v9 = vadd.f32 %v413_v5, %v412_v7 }
  0x2f   : > { %v416_v11 = vadd.f32 %v415_v8, %v414_v9 }
  0x31   : > { %v418_v12 = vadd.f32 %v417_v10, %v416_v11 }
  0x33   : > { %419 = vadd.xlane.f32.xlu0 %v418_v12 }
  0xc0   : > { %v420_v13 = vpop.xlane.xlu0 %419 }
  0xc1   : > { %422 = vst.msk [vmem:[%s294_s29] sm:$0x3f] %vm421_vm1, %v420_v13 }
  0xc2 PF: > { %s13_s14 = sadd.s32 1, %s587_s14   ;;  %s666_s12 = smov %s583_s13 }
  0xc3   : > { %p10_p5 = scmp.ge.s32.totalorder %s13_s14, 4   ;;  %s667_s13 = smov %s669_s15 }
  0xc5   :  { %12 = sbr.rel (!%p10_p5) target bundleno = 2 (0x2), region = 76 }

</bundles_post_ra>
